<compile_context>
chip_gen: v5e
topology: v5e:2x2
jax: 0.10.0
libtpu: 0.0.40
codegen_flags: <defaults>
</compile_context>

<pallas_src>
import math
import functools

import jax
import jax.numpy as jnp
from jax.experimental import pallas as pl
from jax.experimental.pallas import tpu as pltpu

# ----------------------------- configuration --------------------------------
DIM = 32          # model dim D
NHEAD = 4         # number of heads H
HEAD_DIM = DIM // NHEAD
SEQ = 8           # S (== L so the residual `v + msa` is well defined)
BATCH = 2
LN_EPS = 1e-5


# ------------------------------- kernel --------------------------------------
def _attention_kernel(q_ref, k_ref, v_ref, mask_ref, w_ref, vec_ref,
                      o_ref, neg_ref, *, batch, seq, dim, nhead):
    f32 = jnp.float32
    bf16 = jnp.bfloat16
    head_dim = dim // nhead
    scale = f32(1.0 / math.sqrt(head_dim))
    bs = batch * seq                       # batch folded into rows

    q = q_ref[...]                         # (B*S, D) f32
    k = k_ref[...]                         # (B*L, D) f32
    v = v_ref[...]                         # (B*L, D) f32 (kept for residual)

    vecs = vec_ref[...]                    # (6, D) f32: bq,bk,bv,bo,gamma,beta
    bq, bk, bv = vecs[0:1, :], vecs[1:2, :], vecs[2:3, :]
    bo, gamma, beta = vecs[3:4, :], vecs[4:5, :], vecs[5:6, :]

    # QKV projections on the folded (B*S, D) rows: bf16 MXU operands,
    # f32 accumulation (MXU-native on v5e/v6e/v7x).
    q_p = jnp.dot(q.astype(bf16), w_ref[0:dim, :],
                  preferred_element_type=f32) + bq
    k_p = jnp.dot(k.astype(bf16), w_ref[dim:2 * dim, :],
                  preferred_element_type=f32) + bk
    v_p = jnp.dot(v.astype(bf16), w_ref[2 * dim:3 * dim, :],
                  preferred_element_type=f32) + bv
    wo = w_ref[3 * dim:4 * dim, :]         # (D, D) bf16

    # Block-diagonal additive mask over the folded (B*S, B*L) score tile,
    # built once in a small VMEM scratch:
    #   cross-batch blocks -> -1e9 (no attention leakage across the batch)
    #   diagonal blocks    -> user mask (0 => -1e9, nonzero => 0)
    neg_ref[...] = jnp.full((bs, bs), -1e9, f32)
    for b in range(batch):                 # static unroll (B=2)
        r0 = b * seq
        neg_ref[r0:r0 + seq, r0:r0 + seq] = jnp.where(
            mask_ref[b] == 0.0, f32(-1e9), f32(0.0))
    neg = neg_ref[...]                     # (B*S, B*L) f32

    # Per-head attention on the folded rows; output projection folded into the
    # head loop via linearity of Wo.
    contract_feature = (((1,), (1,)), ((), ()))   # q @ k^T without a transpose
    out = jnp.zeros((bs, dim), f32)
    for h in range(nhead):                 # static unroll (H=4)
        lo = h * head_dim
        hi = lo + head_dim
        qh = q_p[:, lo:hi].astype(bf16)    # (B*S, hd)
        kh = k_p[:, lo:hi].astype(bf16)    # (B*L, hd)
        vh = v_p[:, lo:hi].astype(bf16)    # (B*L, hd)

        s = jax.lax.dot_general(qh, kh, contract_feature,
                                preferred_element_type=f32) * scale + neg
        s = s - jnp.max(s, axis=-1, keepdims=True)
        p = jnp.exp(s)                     # cross-batch / masked cols -> 0
        p = p * pl.reciprocal(jnp.sum(p, axis=-1, keepdims=True), approx=True)
        ctx = jnp.dot(p.astype(bf16), vh, preferred_element_type=f32)  # (B*S, hd)
        out = out + jnp.dot(ctx.astype(bf16), wo[lo:hi, :],
                            preferred_element_type=f32)
    out = out + bo

    # Residual + LayerNorm over the feature axis (f32, biased var, eps=1e-5).
    y = v + out
    mean = jnp.mean(y, axis=-1, keepdims=True)
    cent = y - mean
    var = jnp.mean(cent * cent, axis=-1, keepdims=True)
    o_ref[...] = cent * jax.lax.rsqrt(var + LN_EPS) * gamma + beta


# ------------------------------- wrapper -------------------------------------
def pack_params(params):
    """One-time parameter packing, hoisted out of the per-call path."""
    w_pack = jnp.concatenate(
        [params["wq"], params["wk"], params["wv"], params["wo"]],
        axis=0).astype(jnp.bfloat16)                                  # (4D, D)
    vec_pack = jnp.concatenate(
        [params["bq"], params["bk"], params["bv"], params["bo"],
         params["gamma"], params["beta"]], axis=0).astype(jnp.float32)  # (6, D)
    return {"w_pack": w_pack, "vec_pack": vec_pack}


@jax.jit
def attention_module_forward(q, k, v, mask, packed):
    B, S, D = q.shape
    L = k.shape[1]
    assert S == L, "residual v + msa requires S == L"
    bs = B * S
    hd = D // NHEAD

    kernel = functools.partial(_attention_kernel,
                               batch=B, seq=S, dim=D, nhead=NHEAD)

    cost = pl.CostEstimate(
        flops=(2 * 3 * bs * D * D            # QKV projections
               + NHEAD * 4 * bs * bs * hd    # scores + ctx
               + 2 * bs * D * D),            # Wo fold
        transcendentals=NHEAD * bs * bs + NHEAD * bs + bs,
        bytes_accessed=4 * (4 * bs * D + B * S * L + 6 * D) + 2 * 4 * D * D)

    out = pl.pallas_call(
        kernel,
        out_shape=jax.ShapeDtypeStruct((bs, D), jnp.float32),
        scratch_shapes=[pltpu.VMEM((bs, bs), jnp.float32)],  # block-diag mask
        cost_estimate=cost,
        # Gridless call: every operand is whole-array VMEM-resident; no
        # BlockSpec pipelining (total footprint < 50 KiB).
    )(q.reshape(bs, D), k.reshape(bs, D), v.reshape(bs, D), mask,
      packed["w_pack"], packed["vec_pack"])

    return out.reshape(B, S, D)


# --------------------------- pure-JAX reference -------------------------------
def reference_forward(q, k, v, mask, params):
    B, S, D = q.shape

    def proj(x, w, b):
        return x @ w + b[0]

    qp = proj(q, params["wq"], params["bq"]).reshape(B, S, NHEAD, HEAD_DIM).transpose(0, 2, 1, 3)
    kp = proj(k, params["wk"], params["bk"]).reshape(B, -1, NHEAD, HEAD_DIM).transpose(0, 2, 1, 3)
    vp = proj(v, params["wv"], params["bv"]).reshape(B, -1, NHEAD, HEAD_DIM).transpose(0, 2, 1, 3)
    scores = jnp.einsum("bhsd,bhld->bhsl", qp, kp) / math.sqrt(HEAD_DIM)
    scores = jnp.where(mask[:, None, :, :] == 0, -1e9, scores)
    p = jax.nn.softmax(scores, axis=-1)
    ctx = jnp.einsum("bhsl,bhld->bhsd", p, vp).transpose(0, 2, 1, 3).reshape(B, S, D)
    out = ctx @ params["wo"] + params["bo"][0]
    y = v + out
    mean = jnp.mean(y, axis=-1, keepdims=True)
    var = jnp.mean((y - mean) ** 2, axis=-1, keepdims=True)
    return (y - mean) / jnp.sqrt(var + LN_EPS) * params["gamma"][0] + params["beta"][0]


# --------------------------------- main ---------------------------------------
if __name__ == "__main__":
    key = jax.random.PRNGKey(0)
    ks = jax.random.split(key, 16)

    def init_linear(kw, kb):
        bound = 1.0 / math.sqrt(DIM)
        w = jax.random.uniform(kw, (DIM, DIM), jnp.float32, -bound, bound)
        b = jax.random.uniform(kb, (1, DIM), jnp.float32, -bound, bound)
        return w, b

    wq, bq = init_linear(ks[0], ks[1])
    wk, bk = init_linear(ks[2], ks[3])
    wv, bv = init_linear(ks[4], ks[5])
    wo, bo = init_linear(ks[6], ks[7])
    params = dict(
        wq=wq, bq=bq, wk=wk, bk=bk, wv=wv, bv=bv, wo=wo, bo=bo,
        gamma=jnp.ones((1, DIM), jnp.float32),
        beta=jnp.zeros((1, DIM), jnp.float32),
    )
    packed = pack_params(params)          # done once, outside the per-call path

    q = jax.random.normal(ks[8], (BATCH, SEQ, DIM), jnp.float32)
    k = jax.random.normal(ks[9], (BATCH, SEQ, DIM), jnp.float32)
    v = jax.random.normal(ks[10], (BATCH, SEQ, DIM), jnp.float32)
    mask = (jax.random.uniform(ks[11], (BATCH, SEQ, SEQ)) > 0.2).astype(jnp.float32)
    mask = mask.at[:, :, 0].set(1.0)   # guarantee at least one valid key per query

    out = attention_module_forward(q, k, v, mask, packed)
    out = jax.block_until_ready(out)

    ref = reference_forward(q, k, v, mask, params)
    assert out.shape == (BATCH, SEQ, DIM)
    # bf16 MXU operands (~0.4% per matmul) stacked over 4 matmul stages plus the
    # approx-reciprocal softmax denominator (~1e-3) give ~1e-2 absolute error on
    # the O(1) LayerNorm output; structural bugs would still be O(1) off.
    assert jnp.allclose(out, ref, atol=5e-2, rtol=5e-2), "mismatch vs reference"

    print("KERNEL_OK")
</pallas_src>

<mosaic_0001>
module attributes {stable_mosaic.version = 11 : i64} {
  func.func @_attention_kernel(%arg0: memref<16x32xf32, #tpu.memory_space<vmem>>, %arg1: memref<16x32xf32, #tpu.memory_space<vmem>>, %arg2: memref<16x32xf32, #tpu.memory_space<vmem>>, %arg3: memref<2x8x8xf32, #tpu.memory_space<vmem>>, %arg4: memref<128x32xbf16, #tpu.memory_space<vmem>>, %arg5: memref<6x32xf32, #tpu.memory_space<vmem>>, %arg6: memref<16x32xf32, #tpu.memory_space<vmem>>, %arg7: memref<16x16xf32, #tpu.memory_space<vmem>>) attributes {dimension_semantics = [], scalar_prefetch = 0 : i64, scratch_operands = 1 : i64, tpu.core_type = #tpu.core_type<tc>} {
    %c0 = arith.constant 0 : index
    %c0_0 = arith.constant 0 : index
    %0 = vector.load %arg0[%c0, %c0_0] : memref<16x32xf32, #tpu.memory_space<vmem>>, vector<16x32xf32>
    %c0_1 = arith.constant 0 : index
    %c0_2 = arith.constant 0 : index
    %1 = vector.load %arg1[%c0_1, %c0_2] : memref<16x32xf32, #tpu.memory_space<vmem>>, vector<16x32xf32>
    %c0_3 = arith.constant 0 : index
    %c0_4 = arith.constant 0 : index
    %2 = vector.load %arg2[%c0_3, %c0_4] : memref<16x32xf32, #tpu.memory_space<vmem>>, vector<16x32xf32>
    %c0_5 = arith.constant 0 : index
    %c0_6 = arith.constant 0 : index
    %3 = vector.load %arg5[%c0_5, %c0_6] : memref<6x32xf32, #tpu.memory_space<vmem>>, vector<6x32xf32>
    %4 = vector.extract_strided_slice %3 {offsets = [0, 0], sizes = [1, 32], strides = [1, 1]} : vector<6x32xf32> to vector<1x32xf32>
    %5 = vector.extract_strided_slice %3 {offsets = [1, 0], sizes = [1, 32], strides = [1, 1]} : vector<6x32xf32> to vector<1x32xf32>
    %6 = vector.extract_strided_slice %3 {offsets = [2, 0], sizes = [1, 32], strides = [1, 1]} : vector<6x32xf32> to vector<1x32xf32>
    %7 = vector.extract_strided_slice %3 {offsets = [3, 0], sizes = [1, 32], strides = [1, 1]} : vector<6x32xf32> to vector<1x32xf32>
    %8 = vector.extract_strided_slice %3 {offsets = [4, 0], sizes = [1, 32], strides = [1, 1]} : vector<6x32xf32> to vector<1x32xf32>
    %9 = vector.extract_strided_slice %3 {offsets = [5, 0], sizes = [1, 32], strides = [1, 1]} : vector<6x32xf32> to vector<1x32xf32>
    %10 = arith.truncf %0 : vector<16x32xf32> to vector<16x32xbf16>
    %c0_7 = arith.constant 0 : index
    %c0_8 = arith.constant 0 : index
    %11 = vector.load %arg4[%c0_7, %c0_8] : memref<128x32xbf16, #tpu.memory_space<vmem>>, vector<32x32xbf16>
    %cst = arith.constant dense<0.000000e+00> : vector<16x32xf32>
    %12 = tpu.matmul %10, %11, %cst {dimension_numbers = #tpu.dot_dimension_numbers<[1], [0], [0], [1], [0, 0, 1, 1], [], []>} : vector<16x32xbf16>, vector<32x32xbf16>, vector<16x32xf32> -> vector<16x32xf32>
    %13 = vector.broadcast %4 : vector<1x32xf32> to vector<16x32xf32>
    %14 = arith.addf %12, %13 : vector<16x32xf32>
    %15 = arith.truncf %1 : vector<16x32xf32> to vector<16x32xbf16>
    %c32 = arith.constant 32 : index
    %c0_9 = arith.constant 0 : index
    %16 = vector.load %arg4[%c32, %c0_9] : memref<128x32xbf16, #tpu.memory_space<vmem>>, vector<32x32xbf16>
    %cst_10 = arith.constant dense<0.000000e+00> : vector<16x32xf32>
    %17 = tpu.matmul %15, %16, %cst_10 {dimension_numbers = #tpu.dot_dimension_numbers<[1], [0], [0], [1], [0, 0, 1, 1], [], []>} : vector<16x32xbf16>, vector<32x32xbf16>, vector<16x32xf32> -> vector<16x32xf32>
    %18 = vector.broadcast %5 : vector<1x32xf32> to vector<16x32xf32>
    %19 = arith.addf %17, %18 : vector<16x32xf32>
    %20 = arith.truncf %2 : vector<16x32xf32> to vector<16x32xbf16>
    %c64 = arith.constant 64 : index
    %c0_11 = arith.constant 0 : index
    %21 = vector.load %arg4[%c64, %c0_11] : memref<128x32xbf16, #tpu.memory_space<vmem>>, vector<32x32xbf16>
    %cst_12 = arith.constant dense<0.000000e+00> : vector<16x32xf32>
    %22 = tpu.matmul %20, %21, %cst_12 {dimension_numbers = #tpu.dot_dimension_numbers<[1], [0], [0], [1], [0, 0, 1, 1], [], []>} : vector<16x32xbf16>, vector<32x32xbf16>, vector<16x32xf32> -> vector<16x32xf32>
    %23 = vector.broadcast %6 : vector<1x32xf32> to vector<16x32xf32>
    %24 = arith.addf %22, %23 : vector<16x32xf32>
    %c96 = arith.constant 96 : index
    %c0_13 = arith.constant 0 : index
    %25 = vector.load %arg4[%c96, %c0_13] : memref<128x32xbf16, #tpu.memory_space<vmem>>, vector<32x32xbf16>
    %cst_14 = arith.constant -1.000000e+09 : f32
    %26 = vector.broadcast %cst_14 : f32 to vector<16x16xf32>
    %c0_15 = arith.constant 0 : index
    %c0_16 = arith.constant 0 : index
    %27 = vector.load %arg7[%c0_15, %c0_16] : memref<16x16xf32, #tpu.memory_space<vmem>>, vector<16x16xf32>
    tpu.vector_store %arg7[%c0_15, %c0_16], %26 {strides = array<i32>} : memref<16x16xf32, #tpu.memory_space<vmem>>, vector<16x16xf32>,
    %c0_17 = arith.constant 0 : index
    %c0_18 = arith.constant 0 : index
    %c0_19 = arith.constant 0 : index
    %28 = vector.load %arg3[%c0_17, %c0_18, %c0_19] : memref<2x8x8xf32, #tpu.memory_space<vmem>>, vector<1x8x8xf32>
    %29 = vector.shape_cast %28 : vector<1x8x8xf32> to vector<8x8xf32>
    %cst_20 = arith.constant 0.000000e+00 : f32
    %30 = vector.broadcast %cst_20 : f32 to vector<8x8xf32>
    %31 = arith.cmpf oeq, %29, %30 : vector<8x8xf32>
    %cst_21 = arith.constant -1.000000e+09 : f32
    %cst_22 = arith.constant 0.000000e+00 : f32
    %32 = vector.broadcast %cst_21 : f32 to vector<8x8xf32>
    %33 = vector.broadcast %cst_22 : f32 to vector<8x8xf32>
    %34 = arith.select %31, %32, %33 : vector<8x8xi1>, vector<8x8xf32>
    %c0_23 = arith.constant 0 : index
    %c0_24 = arith.constant 0 : index
    %35 = vector.load %arg7[%c0_23, %c0_24] : memref<16x16xf32, #tpu.memory_space<vmem>>, vector<8x8xf32>
    tpu.vector_store %arg7[%c0_23, %c0_24], %34 {strides = array<i32>} : memref<16x16xf32, #tpu.memory_space<vmem>>, vector<8x8xf32>,
    %c1 = arith.constant 1 : index
    %c0_25 = arith.constant 0 : index
    %c0_26 = arith.constant 0 : index
    %36 = vector.load %arg3[%c1, %c0_25, %c0_26] : memref<2x8x8xf32, #tpu.memory_space<vmem>>, vector<1x8x8xf32>
    %37 = vector.shape_cast %36 : vector<1x8x8xf32> to vector<8x8xf32>
    %cst_27 = arith.constant 0.000000e+00 : f32
    %38 = vector.broadcast %cst_27 : f32 to vector<8x8xf32>
    %39 = arith.cmpf oeq, %37, %38 : vector<8x8xf32>
    %cst_28 = arith.constant -1.000000e+09 : f32
    %cst_29 = arith.constant 0.000000e+00 : f32
    %40 = vector.broadcast %cst_28 : f32 to vector<8x8xf32>
    %41 = vector.broadcast %cst_29 : f32 to vector<8x8xf32>
    %42 = arith.select %39, %40, %41 : vector<8x8xi1>, vector<8x8xf32>
    %c8 = arith.constant 8 : index
    %c8_30 = arith.constant 8 : index
    %43 = vector.load %arg7[%c8, %c8_30] : memref<16x16xf32, #tpu.memory_space<vmem>>, vector<8x8xf32>
    tpu.vector_store %arg7[%c8, %c8_30], %42 {strides = array<i32>} : memref<16x16xf32, #tpu.memory_space<vmem>>, vector<8x8xf32>,
    %c0_31 = arith.constant 0 : index
    %c0_32 = arith.constant 0 : index
    %44 = vector.load %arg7[%c0_31, %c0_32] : memref<16x16xf32, #tpu.memory_space<vmem>>, vector<16x16xf32>
    %cst_33 = arith.constant 0.000000e+00 : f32
    %45 = vector.broadcast %cst_33 : f32 to vector<16x32xf32>
    %46 = vector.extract_strided_slice %14 {offsets = [0, 0], sizes = [16, 8], strides = [1, 1]} : vector<16x32xf32> to vector<16x8xf32>
    %47 = arith.truncf %46 : vector<16x8xf32> to vector<16x8xbf16>
    %48 = vector.extract_strided_slice %19 {offsets = [0, 0], sizes = [16, 8], strides = [1, 1]} : vector<16x32xf32> to vector<16x8xf32>
    %49 = arith.truncf %48 : vector<16x8xf32> to vector<16x8xbf16>
    %50 = vector.extract_strided_slice %24 {offsets = [0, 0], sizes = [16, 8], strides = [1, 1]} : vector<16x32xf32> to vector<16x8xf32>
    %51 = arith.truncf %50 : vector<16x8xf32> to vector<16x8xbf16>
    %cst_34 = arith.constant dense<0.000000e+00> : vector<16x16xf32>
    %52 = tpu.matmul %47, %49, %cst_34 {dimension_numbers = #tpu.dot_dimension_numbers<[1], [1], [0], [0], [0, 0, 1, 0], [], []>} : vector<16x8xbf16>, vector<16x8xbf16>, vector<16x16xf32> -> vector<16x16xf32>
    %cst_35 = arith.constant 0.353553385 : f32
    %53 = vector.broadcast %cst_35 : f32 to vector<16x16xf32>
    %54 = arith.mulf %52, %53 : vector<16x16xf32>
    %55 = arith.addf %54, %44 : vector<16x16xf32>
    %cst_36 = arith.constant dense<0xFF800000> : vector<16xf32>
    %56 = vector.multi_reduction <maximumf>, %55, %cst_36 [1] : vector<16x16xf32> to vector<16xf32>
    %57 = vector.shape_cast %56 : vector<16xf32> to vector<16x1xf32>
    %58 = vector.broadcast %57 : vector<16x1xf32> to vector<16x16xf32>
    %59 = arith.subf %55, %58 : vector<16x16xf32>
    %60 = math.exp %59 : vector<16x16xf32>
    %cst_37 = arith.constant dense<0.000000e+00> : vector<16xf32>
    %61 = vector.multi_reduction <add>, %60, %cst_37 [1] : vector<16x16xf32> to vector<16xf32>
    %62 = vector.shape_cast %61 : vector<16xf32> to vector<16x1xf32>
    %63 = tpu.reciprocal %62 {approx = true} : vector<16x1xf32> -> vector<16x1xf32>
    %64 = vector.broadcast %63 : vector<16x1xf32> to vector<16x16xf32>
    %65 = arith.mulf %60, %64 : vector<16x16xf32>
    %66 = arith.truncf %65 : vector<16x16xf32> to vector<16x16xbf16>
    %cst_38 = arith.constant dense<0.000000e+00> : vector<16x8xf32>
    %67 = tpu.matmul %66, %51, %cst_38 {dimension_numbers = #tpu.dot_dimension_numbers<[1], [0], [0], [1], [0, 0, 1, 1], [], []>} : vector<16x16xbf16>, vector<16x8xbf16>, vector<16x8xf32> -> vector<16x8xf32>
    %68 = arith.truncf %67 : vector<16x8xf32> to vector<16x8xbf16>
    %69 = vector.extract_strided_slice %25 {offsets = [0, 0], sizes = [8, 32], strides = [1, 1]} : vector<32x32xbf16> to vector<8x32xbf16>
    %cst_39 = arith.constant dense<0.000000e+00> : vector<16x32xf32>
    %70 = tpu.matmul %68, %69, %cst_39 {dimension_numbers = #tpu.dot_dimension_numbers<[1], [0], [0], [1], [0, 0, 1, 1], [], []>} : vector<16x8xbf16>, vector<8x32xbf16>, vector<16x32xf32> -> vector<16x32xf32>
    %71 = arith.addf %45, %70 : vector<16x32xf32>
    %72 = vector.extract_strided_slice %14 {offsets = [0, 8], sizes = [16, 8], strides = [1, 1]} : vector<16x32xf32> to vector<16x8xf32>
    %73 = arith.truncf %72 : vector<16x8xf32> to vector<16x8xbf16>
    %74 = vector.extract_strided_slice %19 {offsets = [0, 8], sizes = [16, 8], strides = [1, 1]} : vector<16x32xf32> to vector<16x8xf32>
    %75 = arith.truncf %74 : vector<16x8xf32> to vector<16x8xbf16>
    %76 = vector.extract_strided_slice %24 {offsets = [0, 8], sizes = [16, 8], strides = [1, 1]} : vector<16x32xf32> to vector<16x8xf32>
    %77 = arith.truncf %76 : vector<16x8xf32> to vector<16x8xbf16>
    %cst_40 = arith.constant dense<0.000000e+00> : vector<16x16xf32>
    %78 = tpu.matmul %73, %75, %cst_40 {dimension_numbers = #tpu.dot_dimension_numbers<[1], [1], [0], [0], [0, 0, 1, 0], [], []>} : vector<16x8xbf16>, vector<16x8xbf16>, vector<16x16xf32> -> vector<16x16xf32>
    %cst_41 = arith.constant 0.353553385 : f32
    %79 = vector.broadcast %cst_41 : f32 to vector<16x16xf32>
    %80 = arith.mulf %78, %79 : vector<16x16xf32>
    %81 = arith.addf %80, %44 : vector<16x16xf32>
    %cst_42 = arith.constant dense<0xFF800000> : vector<16xf32>
    %82 = vector.multi_reduction <maximumf>, %81, %cst_42 [1] : vector<16x16xf32> to vector<16xf32>
    %83 = vector.shape_cast %82 : vector<16xf32> to vector<16x1xf32>
    %84 = vector.broadcast %83 : vector<16x1xf32> to vector<16x16xf32>
    %85 = arith.subf %81, %84 : vector<16x16xf32>
    %86 = math.exp %85 : vector<16x16xf32>
    %cst_43 = arith.constant dense<0.000000e+00> : vector<16xf32>
    %87 = vector.multi_reduction <add>, %86, %cst_43 [1] : vector<16x16xf32> to vector<16xf32>
    %88 = vector.shape_cast %87 : vector<16xf32> to vector<16x1xf32>
    %89 = tpu.reciprocal %88 {approx = true} : vector<16x1xf32> -> vector<16x1xf32>
    %90 = vector.broadcast %89 : vector<16x1xf32> to vector<16x16xf32>
    %91 = arith.mulf %86, %90 : vector<16x16xf32>
    %92 = arith.truncf %91 : vector<16x16xf32> to vector<16x16xbf16>
    %cst_44 = arith.constant dense<0.000000e+00> : vector<16x8xf32>
    %93 = tpu.matmul %92, %77, %cst_44 {dimension_numbers = #tpu.dot_dimension_numbers<[1], [0], [0], [1], [0, 0, 1, 1], [], []>} : vector<16x16xbf16>, vector<16x8xbf16>, vector<16x8xf32> -> vector<16x8xf32>
    %94 = arith.truncf %93 : vector<16x8xf32> to vector<16x8xbf16>
    %95 = vector.extract_strided_slice %25 {offsets = [8, 0], sizes = [8, 32], strides = [1, 1]} : vector<32x32xbf16> to vector<8x32xbf16>
    %cst_45 = arith.constant dense<0.000000e+00> : vector<16x32xf32>
    %96 = tpu.matmul %94, %95, %cst_45 {dimension_numbers = #tpu.dot_dimension_numbers<[1], [0], [0], [1], [0, 0, 1, 1], [], []>} : vector<16x8xbf16>, vector<8x32xbf16>, vector<16x32xf32> -> vector<16x32xf32>
    %97 = arith.addf %71, %96 : vector<16x32xf32>
    %98 = vector.extract_strided_slice %14 {offsets = [0, 16], sizes = [16, 8], strides = [1, 1]} : vector<16x32xf32> to vector<16x8xf32>
    %99 = arith.truncf %98 : vector<16x8xf32> to vector<16x8xbf16>
    %100 = vector.extract_strided_slice %19 {offsets = [0, 16], sizes = [16, 8], strides = [1, 1]} : vector<16x32xf32> to vector<16x8xf32>
    %101 = arith.truncf %100 : vector<16x8xf32> to vector<16x8xbf16>
    %102 = vector.extract_strided_slice %24 {offsets = [0, 16], sizes = [16, 8], strides = [1, 1]} : vector<16x32xf32> to vector<16x8xf32>
    %103 = arith.truncf %102 : vector<16x8xf32> to vector<16x8xbf16>
    %cst_46 = arith.constant dense<0.000000e+00> : vector<16x16xf32>
    %104 = tpu.matmul %99, %101, %cst_46 {dimension_numbers = #tpu.dot_dimension_numbers<[1], [1], [0], [0], [0, 0, 1, 0], [], []>} : vector<16x8xbf16>, vector<16x8xbf16>, vector<16x16xf32> -> vector<16x16xf32>
    %cst_47 = arith.constant 0.353553385 : f32
    %105 = vector.broadcast %cst_47 : f32 to vector<16x16xf32>
    %106 = arith.mulf %104, %105 : vector<16x16xf32>
    %107 = arith.addf %106, %44 : vector<16x16xf32>
    %cst_48 = arith.constant dense<0xFF800000> : vector<16xf32>
    %108 = vector.multi_reduction <maximumf>, %107, %cst_48 [1] : vector<16x16xf32> to vector<16xf32>
    %109 = vector.shape_cast %108 : vector<16xf32> to vector<16x1xf32>
    %110 = vector.broadcast %109 : vector<16x1xf32> to vector<16x16xf32>
    %111 = arith.subf %107, %110 : vector<16x16xf32>
    %112 = math.exp %111 : vector<16x16xf32>
    %cst_49 = arith.constant dense<0.000000e+00> : vector<16xf32>
    %113 = vector.multi_reduction <add>, %112, %cst_49 [1] : vector<16x16xf32> to vector<16xf32>
    %114 = vector.shape_cast %113 : vector<16xf32> to vector<16x1xf32>
    %115 = tpu.reciprocal %114 {approx = true} : vector<16x1xf32> -> vector<16x1xf32>
    %116 = vector.broadcast %115 : vector<16x1xf32> to vector<16x16xf32>
    %117 = arith.mulf %112, %116 : vector<16x16xf32>
    %118 = arith.truncf %117 : vector<16x16xf32> to vector<16x16xbf16>
    %cst_50 = arith.constant dense<0.000000e+00> : vector<16x8xf32>
    %119 = tpu.matmul %118, %103, %cst_50 {dimension_numbers = #tpu.dot_dimension_numbers<[1], [0], [0], [1], [0, 0, 1, 1], [], []>} : vector<16x16xbf16>, vector<16x8xbf16>, vector<16x8xf32> -> vector<16x8xf32>
    %120 = arith.truncf %119 : vector<16x8xf32> to vector<16x8xbf16>
    %121 = vector.extract_strided_slice %25 {offsets = [16, 0], sizes = [8, 32], strides = [1, 1]} : vector<32x32xbf16> to vector<8x32xbf16>
    %cst_51 = arith.constant dense<0.000000e+00> : vector<16x32xf32>
    %122 = tpu.matmul %120, %121, %cst_51 {dimension_numbers = #tpu.dot_dimension_numbers<[1], [0], [0], [1], [0, 0, 1, 1], [], []>} : vector<16x8xbf16>, vector<8x32xbf16>, vector<16x32xf32> -> vector<16x32xf32>
    %123 = arith.addf %97, %122 : vector<16x32xf32>
    %124 = vector.extract_strided_slice %14 {offsets = [0, 24], sizes = [16, 8], strides = [1, 1]} : vector<16x32xf32> to vector<16x8xf32>
    %125 = arith.truncf %124 : vector<16x8xf32> to vector<16x8xbf16>
    %126 = vector.extract_strided_slice %19 {offsets = [0, 24], sizes = [16, 8], strides = [1, 1]} : vector<16x32xf32> to vector<16x8xf32>
    %127 = arith.truncf %126 : vector<16x8xf32> to vector<16x8xbf16>
    %128 = vector.extract_strided_slice %24 {offsets = [0, 24], sizes = [16, 8], strides = [1, 1]} : vector<16x32xf32> to vector<16x8xf32>
    %129 = arith.truncf %128 : vector<16x8xf32> to vector<16x8xbf16>
    %cst_52 = arith.constant dense<0.000000e+00> : vector<16x16xf32>
    %130 = tpu.matmul %125, %127, %cst_52 {dimension_numbers = #tpu.dot_dimension_numbers<[1], [1], [0], [0], [0, 0, 1, 0], [], []>} : vector<16x8xbf16>, vector<16x8xbf16>, vector<16x16xf32> -> vector<16x16xf32>
    %cst_53 = arith.constant 0.353553385 : f32
    %131 = vector.broadcast %cst_53 : f32 to vector<16x16xf32>
    %132 = arith.mulf %130, %131 : vector<16x16xf32>
    %133 = arith.addf %132, %44 : vector<16x16xf32>
    %cst_54 = arith.constant dense<0xFF800000> : vector<16xf32>
    %134 = vector.multi_reduction <maximumf>, %133, %cst_54 [1] : vector<16x16xf32> to vector<16xf32>
    %135 = vector.shape_cast %134 : vector<16xf32> to vector<16x1xf32>
    %136 = vector.broadcast %135 : vector<16x1xf32> to vector<16x16xf32>
    %137 = arith.subf %133, %136 : vector<16x16xf32>
    %138 = math.exp %137 : vector<16x16xf32>
    %cst_55 = arith.constant dense<0.000000e+00> : vector<16xf32>
    %139 = vector.multi_reduction <add>, %138, %cst_55 [1] : vector<16x16xf32> to vector<16xf32>
    %140 = vector.shape_cast %139 : vector<16xf32> to vector<16x1xf32>
    %141 = tpu.reciprocal %140 {approx = true} : vector<16x1xf32> -> vector<16x1xf32>
    %142 = vector.broadcast %141 : vector<16x1xf32> to vector<16x16xf32>
    %143 = arith.mulf %138, %142 : vector<16x16xf32>
    %144 = arith.truncf %143 : vector<16x16xf32> to vector<16x16xbf16>
    %cst_56 = arith.constant dense<0.000000e+00> : vector<16x8xf32>
    %145 = tpu.matmul %144, %129, %cst_56 {dimension_numbers = #tpu.dot_dimension_numbers<[1], [0], [0], [1], [0, 0, 1, 1], [], []>} : vector<16x16xbf16>, vector<16x8xbf16>, vector<16x8xf32> -> vector<16x8xf32>
    %146 = arith.truncf %145 : vector<16x8xf32> to vector<16x8xbf16>
    %147 = vector.extract_strided_slice %25 {offsets = [24, 0], sizes = [8, 32], strides = [1, 1]} : vector<32x32xbf16> to vector<8x32xbf16>
    %cst_57 = arith.constant dense<0.000000e+00> : vector<16x32xf32>
    %148 = tpu.matmul %146, %147, %cst_57 {dimension_numbers = #tpu.dot_dimension_numbers<[1], [0], [0], [1], [0, 0, 1, 1], [], []>} : vector<16x8xbf16>, vector<8x32xbf16>, vector<16x32xf32> -> vector<16x32xf32>
    %149 = arith.addf %123, %148 : vector<16x32xf32>
    %150 = vector.broadcast %7 : vector<1x32xf32> to vector<16x32xf32>
    %151 = arith.addf %149, %150 : vector<16x32xf32>
    %152 = arith.addf %2, %151 : vector<16x32xf32>
    %cst_58 = arith.constant dense<0.000000e+00> : vector<16xf32>
    %153 = vector.multi_reduction <add>, %152, %cst_58 [1] : vector<16x32xf32> to vector<16xf32>
    %154 = vector.shape_cast %153 : vector<16xf32> to vector<16x1xf32>
    %cst_59 = arith.constant 3.200000e+01 : f32
    %155 = vector.broadcast %cst_59 : f32 to vector<16x1xf32>
    %156 = arith.divf %154, %155 : vector<16x1xf32>
    %157 = vector.broadcast %156 : vector<16x1xf32> to vector<16x32xf32>
    %158 = arith.subf %152, %157 : vector<16x32xf32>
    %159 = arith.mulf %158, %158 : vector<16x32xf32>
    %cst_60 = arith.constant dense<0.000000e+00> : vector<16xf32>
    %160 = vector.multi_reduction <add>, %159, %cst_60 [1] : vector<16x32xf32> to vector<16xf32>
    %161 = vector.shape_cast %160 : vector<16xf32> to vector<16x1xf32>
    %cst_61 = arith.constant 3.200000e+01 : f32
    %162 = vector.broadcast %cst_61 : f32 to vector<16x1xf32>
    %163 = arith.divf %161, %162 : vector<16x1xf32>
    %cst_62 = arith.constant 9.99999974E-6 : f32
    %164 = vector.broadcast %cst_62 : f32 to vector<16x1xf32>
    %165 = arith.addf %163, %164 : vector<16x1xf32>
    %166 = math.rsqrt %165 : vector<16x1xf32>
    %167 = vector.broadcast %166 : vector<16x1xf32> to vector<16x32xf32>
    %168 = arith.mulf %158, %167 : vector<16x32xf32>
    %169 = vector.broadcast %8 : vector<1x32xf32> to vector<16x32xf32>
    %170 = arith.mulf %168, %169 : vector<16x32xf32>
    %171 = vector.broadcast %9 : vector<1x32xf32> to vector<16x32xf32>
    %172 = arith.addf %170, %171 : vector<16x32xf32>
    %c0_63 = arith.constant 0 : index
    %c0_64 = arith.constant 0 : index
    %173 = vector.load %arg6[%c0_63, %c0_64] : memref<16x32xf32, #tpu.memory_space<vmem>>, vector<16x32xf32>
    tpu.vector_store %arg6[%c0_63, %c0_64], %172 {strides = array<i32>} : memref<16x32xf32, #tpu.memory_space<vmem>>, vector<16x32xf32>,
    return
  }
}

</mosaic_0001>

<bundles_post_ra>
// kernel: attention_module_forward.1
= control target key start
LH: loop header
LB: loop body
LE: loop exit
PB: predicated region body
PF: predicated region fallthrough
CT: control target
= control target key end

     0   :  { %s942_s0 = inlined_call_operand.vmem [shape: f32[16,32], index: 0, kind: input, shape index: {}]   ;;  %s943_s1 = inlined_call_operand.vmem [shape: f32[16,32], index: 1, kind: input, shape index: {}]   ;;  %s944_s2 = inlined_call_operand.vmem [shape: f32[16,32], index: 2, kind: input, shape index: {}]   ;;  %s945_s3 = inlined_call_operand.vmem [shape: f32[2,8,8], index: 3, kind: input, shape index: {}]   ;;  %s946_s4 = inlined_call_operand.vmem [shape: bf16[128,32], index: 4, kind: input, shape index: {}]   ;;  %s947_s5 = inlined_call_operand.vmem [shape: f32[6,32], index: 5, kind: input, shape index: {}]   ;;  %s948_s6 = inlined_call_operand.hbm [shape: f32[16,32], index: 6, kind: output, shape index: {}]  }
   0x1   :  { %v657_v0 = vld [vmem:[%s946_s4 + $0x8] sm:$0xff]  ;;  %v659_v1 = vld [vmem:[%s946_s4 + $0x18] sm:$0xff]  ;;  %v656_v2 = vld [vmem:[%s946_s4] sm:$0xff] }
   0x2   :  { %v658_v3 = vld [vmem:[%s946_s4 + $0x10] sm:$0xff]  ;;  %v25_v4 = vld [vmem:[%s942_s0] sm:$0xff]  ;;  %60 = vmatpush.bf16.msra.mxu0 %v657_v0  ;;  %95 = vmatpush.bf16.msra.mxu1 %v659_v1  ;;  %v26_v5 = vld [vmem:[%s942_s0 + $0x8] sm:$0xff] }
   0x3   :  { %v27_v6 = vld [vmem:[%s943_s1] sm:$0xff]  ;;  %v28_v7 = vld [vmem:[%s943_s1 + $0x8] sm:$0xff] }
   0x4   :  { %11 = vsyncpa [#allocation4], 0  ;;  %v32_v8 = vpack.c.bf16 %v26_v5, %v25_v4  ;;  %v68_v9 = vpack.c.bf16 %v28_v7, %v27_v6  ;;  %vm50_vm0 = vcmask 261120   ;;  %v643_v10 = vld [vmem:[%s945_s3 + $0x8] sm:$0xff]  ;;  %vm142_vm1 = vcmask 130048   ;;  %v145_v11 = vld [vmem:[%s945_s3] sm:$0xff] }
   0x5   :  { %vm152_vm2 = vcmp.eq.f32.partialorder %v643_v10, 0.0  ;;  %v735_v12 = vmov -1e+09   ;;  %vm146_vm3 = vcmp.eq.f32.partialorder %v145_v11, 0.0  ;;  %vm148_vm4 = vcmask 64512   ;;  %s737_s1 = smov 8  }
   0x6   :  { %61 = vmatpush.bf16.msra.mxu0 %v656_v2  ;;  %96 = vmatpush.bf16.msra.mxu1 %v658_v3  ;;  %143 = vst.msk [vmem:[#allocation2] sm:$0xff] %vm142_vm1, %v735_v12  ;;  %v736_v13 = vmov 0.0   ;;  %v818_v17 = vld [vmem:[%s947_s5] sm:$0x3f]  ;;  %vm158_vm5 = vcmask 130112   ;;  %v661_v31 = vld [vmem:[%s946_s4 + $0x28] sm:$0xff] }
   0x7   :  { %v153_v14 = vsel %vm152_vm2, -1e+09, %v736_v13  ;;  %v147_v15 = vsel %vm146_vm3, -1e+09, %v736_v13  ;;  %144 = vst.msk [vmem:[#allocation2 + $0x8] sm:$0xff] %vm142_vm1, %v735_v12  ;;  %v73_v19 = vperm.slane %v818_v17, 1  ;;  %130 = vmatpush.bf16.msra.mxu2 %v661_v31 }
   0x8   :  { %155 = vrot.lane.b32.xlu0 %v153_v14, %s737_s1  ;;  %149 = vst.msk [vmem:[#allocation2] sm:$0xff] %vm148_vm4, %v147_v15  ;;  %v37_v23 = vperm.slane %v818_v17, 0  ;;  %v660_v32 = vld [vmem:[%s946_s4 + $0x20] sm:$0xff]  ;;  %v838_v34 = vld [vmem:[%s944_s2 + $0x8] sm:$0xff]  ;;  %s739_s24 = smov 104   ;;  %s740_s25 = smov 112  }
   0x9   :  { %624 = vmatmul.msk.bf16.vlgmr.msra.gmra.mxu0 %vm50_vm0, %v32_v8  ;;  %633 = vmatmul.msk.bf16.vlgmr.msra.gmra.mxu1 %vm50_vm0, %v68_v9  ;;  %v833_v33 = vld [vmem:[%s944_s2] sm:$0xff]  ;;  %s738_s2 = smov 120   ;;  %v108_v57 = vperm.slane %v818_v17, 2  ;;  %v138_v62 = vld [vmem:[%s946_s4 + $0x30] sm:$0xf]  ;;  %vm308_vm6 = vcmask 1043456  }
   0xa   :  { %v103_v35 = vpack.c.bf16 %v838_v34, %v833_v33  ;;  %v330_v63 = vsel %vm308_vm6, %v138_v62, 0  ;;  %s604_s13 = sshll.u32 %s948_s6, 4  ;;  %s743_s0 = smov 128   ;;  %s605_s13 = int_to_ptr.hbm [resolvable:$true] %s604_s13 }
   0xb   :  { %131 = vmatpush.bf16.msra.mxu2 %v660_v32 }
   0xe   :  { %642 = vmatmul.msk.bf16.vlgmr.msra.gmra.mxu2 %vm50_vm0, %v103_v35 }
   0xf   :  { %v843_v37 = vld [vmem:[#allocation2] sm:$0xff] }
  0x7a   :  { %v156_v30 = vpop.permute.xlu0 %155 }
  0x7b   :  { %159 = vst.msk [vmem:[#allocation2 + $0x8] sm:$0xff] %vm158_vm5, %v156_v30 }
  0x82   :  { %v847_v42 = vld [vmem:[#allocation2 + $0x8] sm:$0xff] }
  0x86   :  { %v98_v16 = vpop.f32.mrf.mxu1  ;;  %v63_v18 = vpop.f32.mrf.mxu0 }
  0x87   :  { %v99_v21 = vadd.f32 %v98_v16, %v73_v19  ;;  %v64_v27 = vadd.f32 %v63_v18, %v37_v23 }
  0x8e   :  { %v100_v20 = vpop.f32.mrf.mxu1  ;;  %v65_v25 = vpop.f32.mrf.mxu0 }
  0x8f   :  { %v101_v22 = vadd.f32 %v100_v20, %v73_v19  ;;  %v66_v28 = vadd.f32 %v65_v25, %v37_v23 }
  0x91   :  { %v163_v24 = vpack.c.bf16 %v101_v22, %v99_v21  ;;  %v162_v29 = vpack.c.bf16 %v66_v28, %v64_v27  ;;  %v133_v56 = vpop.f32.mrf.mxu2 }
  0x92   :  { %v134_v58 = vadd.f32 %v133_v56, %v108_v57 }
  0x93   :  { %v169_v26 = vsel %vm148_vm4, %v163_v24, 0 }
  0x94   :  { %178 = vmatpush.bf16.xpose.msra.mxu3 %v169_v26 }
  0x99   :  { %v135_v59 = vpop.f32.mrf.mxu2 }
  0x9a   :  { %v136_v60 = vadd.f32 %v135_v59, %v108_v57 }
  0x9b   :  { %644 = vmatmul.msk.bf16.vlgmr.msra.gmra.mxu3 %vm148_vm4, %v162_v29 }
  0x9c   :  { %v860_v61 = vpack.c.bf16 %v136_v60, %v134_v58 }
  0x9e   :  { %222 = vmatpush.bf16.msrb.mxu0 %v860_v61 }
  0xa2   :  { %339 = vmatpush.bf16.msra.mxu0 %v330_v63 }
 0x11e   :  { %v180_v36 = vpop.f32.mrf.mxu3 }
 0x11f   :  { %v185_v38 = vmul.f32 0.35355338, %v180_v36 }
 0x121   :  { %v187_v39 = vadd.f32 %v185_v38, %v843_v37 }
 0x123   :  { %v189_v40 = vsel %vm142_vm1, %v187_v39, -inf }
 0x124   :  { %190 = vmax.xlane.f32.xlu0 %v189_v40 }
 0x126   :  { %v182_v41 = vpop.f32.mrf.mxu3 }
 0x127   :  { %v186_v43 = vmul.f32 0.35355338, %v182_v41 }
 0x129   :  { %v188_v44 = vadd.f32 %v186_v43, %v847_v42 }
 0x12b   :  { %v192_v45 = vsel %vm142_vm1, %v188_v44, -inf }
 0x12c   :  { %193 = vmax.xlane.f32.xlu1 %v192_v45 }
 0x197   :  { %v191_v46 = vpop.xlane.xlu0 %190 }
 0x198   :  { %v195_v47 = vsub.f32 %v187_v39, %v191_v46 }
 0x19a   :  { %v197_v48 = vmul.f32 1.442695, %v195_v47 }
 0x19c   :  { %671 = vpow2.f32 %v197_v48 }
 0x19f   :  { %v194_v49 = vpop.xlane.xlu1 %193 }
 0x1a0   :  { %v196_v50 = vsub.f32 %v188_v44, %v194_v49 }
 0x1a2   :  { %v672_v51 = vpop.eup %671  ;;  %v199_v52 = vmul.f32 1.442695, %v196_v50 }
 0x1a3   :  { %v201_v53 = vsel %vm142_vm1, %v672_v51, 0.0 }
 0x1a4   :  { %673 = vpow2.f32 %v199_v52  ;;  %202 = vadd.xlane.f32.xlu1 %v201_v53 }
 0x1aa   :  { %v674_v54 = vpop.eup %673 }
 0x1ab   :  { %v204_v55 = vsel %vm142_vm1, %v674_v54, 0.0 }
 0x1ac   :  { %205 = vadd.xlane.f32.xlu2 %v204_v55 }
 0x1bd   :  { %231 = vrot.lane.b32.xlu1 %v162_v29, %s738_s2 }
 0x1c4   :  { %234 = vrot.lane.b32.xlu2 %v163_v24, %s738_s2 }
 0x1c5   :  { %442 = vrot.lane.b32.xlu1 %v163_v24, %s739_s24 }
 0x1cc   :  { %348 = vrot.lane.b32.xlu2 %v163_v24, %s740_s25 }
 0x1d4   :  { %346 = vrot.lane.b32.xlu2 %v162_v29, %s740_s25 }
 0x1dc   :  { %440 = vrot.lane.b32.xlu2 %v162_v29, %s739_s24 }
 0x217   :  { %v203_v0 = vpop.xlane.xlu1 %202 }
 0x218   :  { %675 = vrcp.f32 %v203_v0 }
 0x21e   :  { %v676_v2 = vpop.eup %675 }
 0x21f   :  { %v206_v1 = vpop.xlane.xlu2 %205  ;;  %v209_v4 = vmul.f32 %v676_v2, %v672_v51 }
 0x220   :  { %677 = vrcp.f32 %v206_v1 }
 0x226   :  { %v678_v3 = vpop.eup %677 }
 0x227   :  { %v210_v5 = vmul.f32 %v678_v3, %v674_v54  ;;  %v235_v6 = vpop.permute.xlu2 %234 }
 0x228   :  { %v240_v7 = vsel %vm148_vm4, %v235_v6, 0 }
 0x229   :  { %249 = vmatpush.bf16.xpose.msrb.mxu1 %v240_v7  ;;  %v211_v8 = vpack.c.bf16 %v210_v5, %v209_v4 }
 0x22b   :  { %645 = vmatmul.msk.bf16.vlgmr.msrb.gmra.mxu0 %vm142_vm1, %v211_v8 }
 0x22f   :  { %v349_v9 = vpop.permute.xlu2 %348  ;;  %v232_v10 = vpop.permute.xlu1 %231 }
 0x230   :  { %v354_v11 = vsel %vm148_vm4, %v349_v9, 0  ;;  %646 = vmatmul.msk.bf16.vlgmr.msrb.gmra.mxu1 %vm148_vm4, %v232_v10 }
 0x231   :  { %363 = vmatpush.bf16.xpose.msra.mxu1 %v354_v11 }
 0x237   :  { %v443_v12 = vpop.permute.xlu1 %442  ;;  %v347_v14 = vpop.permute.xlu2 %346 }
 0x238   :  { %v448_v13 = vsel %vm148_vm4, %v443_v12, 0 }
 0x239   :  { %457 = vmatpush.bf16.xpose.msrb.mxu0 %v448_v13 }
 0x23f   :  { %v441_v30 = vpop.permute.xlu2 %440 }
 0x240   :  { %650 = vmatmul.msk.bf16.vlgmr.msra.gmra.mxu1 %vm148_vm4, %v347_v14 }
 0x2a8   :  { %v224_v15 = vpop.f32.mrf.mxu0 }
 0x2ad   :  { %v251_v16 = vpop.f32.mrf.mxu1 }
 0x2ae   :  { %v256_v18 = vmul.f32 0.35355338, %v251_v16 }
 0x2b0   :  { %v226_v19 = vpop.f32.mrf.mxu0  ;;  %v258_v20 = vadd.f32 %v256_v18, %v843_v37 }
 0x2b1   :  { %v229_v21 = vpack.c.bf16 %v226_v19, %v224_v15 }
 0x2b2   :  { %v260_v22 = vsel %vm142_vm1, %v258_v20, -inf }
 0x2b3   :  { %649 = vmatmul.msk.bf16.vlgmr.msra.gmra.mxu0 %vm148_vm4, %v229_v21  ;;  %261 = vmax.xlane.f32.xlu1 %v260_v22 }
 0x2b5   :  { %v253_v23 = vpop.f32.mrf.mxu1 }
 0x2b6   :  { %v257_v24 = vmul.f32 0.35355338, %v253_v23 }
 0x2b8   :  { %v259_v25 = vadd.f32 %v257_v24, %v847_v42 }
 0x2ba   :  { %v263_v26 = vsel %vm142_vm1, %v259_v25, -inf }
 0x2bb   :  { %264 = vmax.xlane.f32.xlu0 %v263_v26 }
 0x2bd   :  { %v365_v27 = vpop.f32.mrf.mxu1 }
 0x2be   :  { %v370_v28 = vmul.f32 0.35355338, %v365_v27 }
 0x2c0   :  { %v372_v29 = vadd.f32 %v370_v28, %v843_v37 }
 0x2c2   :  { %v374_v31 = vsel %vm142_vm1, %v372_v29, -inf }
 0x2c3   :  { %375 = vmax.xlane.f32.xlu2 %v374_v31  ;;  %653 = vmatmul.msk.bf16.vlgmr.msrb.gmra.mxu0 %vm148_vm4, %v441_v30 }
 0x2c5   :  { %v367_v32 = vpop.f32.mrf.mxu1 }
 0x2c6   :  { %v371_v35 = vmul.f32 0.35355338, %v367_v32 }
 0x2c8   :  { %v373_v36 = vadd.f32 %v371_v35, %v847_v42 }
 0x2ca   :  { %v377_v38 = vsel %vm142_vm1, %v373_v36, -inf }
 0x2cb   :  { %378 = vmax.xlane.f32.xlu0 %v377_v38 }
 0x2cc   :  { %284 = vrot.lane.b32.xlu1 %v860_v61, %s738_s2 }
 0x326   :  { %v262_v39 = vpop.xlane.xlu1 %261 }
 0x327   :  { %v266_v40 = vsub.f32 %v258_v20, %v262_v39 }
 0x329   :  { %v268_v41 = vmul.f32 1.442695, %v266_v40 }
 0x32b   :  { %679 = vpow2.f32 %v268_v41 }
 0x32e   :  { %v265_v53 = vpop.xlane.xlu0 %264 }
 0x32f   :  { %v267_v57 = vsub.f32 %v259_v25, %v265_v53 }
 0x330   :  { %v885_v43 = vpop.f32.mrf.mxu0 }
 0x331   :  { %v680_v44 = vpop.eup %679  ;;  %v270_v59 = vmul.f32 1.442695, %v267_v57 }
 0x332   :  { %v272_v45 = vsel %vm142_vm1, %v680_v44, 0.0 }
 0x333   :  { %273 = vadd.xlane.f32.xlu0 %v272_v45 }
 0x336   :  { %v376_v46 = vpop.xlane.xlu2 %375 }
 0x337   :  { %v380_v47 = vsub.f32 %v372_v29, %v376_v46  ;;  %v139_v29 = vld [vmem:[%s946_s4 + $0x34] sm:$0xf] }
 0x338   :  { %v888_v48 = vpop.f32.mrf.mxu0  ;;  %v310_v31 = vsel %vm308_vm6, %v139_v29, 0 }
 0x339   :  { %v382_v49 = vmul.f32 1.442695, %v380_v47  ;;  %319 = vmatpush.bf16.msrb.mxu3 %v310_v31 }
 0x33b   :  { %681 = vpow2.f32 %v382_v49 }
 0x33c   :  { %683 = vpow2.f32 %v270_v59 }
 0x33e   :  { %v285_v50 = vpop.permute.xlu1 %284  ;;  %v379_v62 = vpop.xlane.xlu0 %378 }
 0x33f   :  { %297 = vmatpush.bf16.msrb.mxu2 %v285_v50  ;;  %v381_v1 = vsub.f32 %v373_v36, %v379_v62  ;;  %v140_v50 = vld [vmem:[%s946_s4 + $0x38] sm:$0xf] }
 0x340   :  { %v459_v51 = vpop.f32.mrf.mxu0 }
 0x341   :  { %v890_v52 = vpop.eup %681  ;;  %v464_v54 = vmul.f32 0.35355338, %v459_v51  ;;  %v384_v3 = vmul.f32 1.442695, %v381_v1  ;;  %v422_v51 = vsel %vm308_vm6, %v140_v50, 0 }
 0x342   :  { %v386_v55 = vsel %vm142_vm1, %v890_v52, 0.0  ;;  %v684_v4 = vpop.eup %683  ;;  %431 = vmatpush.bf16.msra.mxu3 %v422_v51  ;;  %v593_v51 = vperm.slane %v818_v17, 5 }
 0x343   :  { %387 = vadd.xlane.f32.xlu2 %v386_v55  ;;  %v466_v56 = vadd.f32 %v464_v54, %v843_v37  ;;  %685 = vpow2.f32 %v384_v3  ;;  %v275_v37 = vsel %vm142_vm1, %v684_v4, 0.0 }
 0x345   :  { %v468_v58 = vsel %vm142_vm1, %v466_v56, -inf }
 0x346   :  { %469 = vmax.xlane.f32.xlu0 %v468_v58 }
 0x348   :  { %v461_v60 = vpop.f32.mrf.mxu0 }
 0x349   :  { %v465_v63 = vmul.f32 0.35355338, %v461_v60  ;;  %v686_v5 = vpop.eup %685 }
 0x34a   :  { %v389_v6 = vsel %vm142_vm1, %v686_v5, 0.0 }
 0x34b   :  { %v467_v0 = vadd.f32 %v465_v63, %v847_v42 }
 0x34d   :  { %v471_v2 = vsel %vm142_vm1, %v467_v0, -inf }
 0x34e   :  { %472 = vmax.xlane.f32.xlu0 %v471_v2  ;;  %v534_v2 = vperm.slane %v818_v17, 3 }
 0x356   :  { %276 = vadd.xlane.f32.xlu0 %v275_v37 }
 0x35e   :  { %390 = vadd.xlane.f32.xlu0 %v389_v6 }
 0x3a6   :  { %v274_v7 = vpop.xlane.xlu0 %273 }
 0x3b6   :  { %v388_v24 = vpop.xlane.xlu2 %387 }
 0x3b9   :  { %v470_v8 = vpop.xlane.xlu0 %469 }
 0x3ba   :  { %v474_v9 = vsub.f32 %v466_v56, %v470_v8 }
 0x3bc   :  { %v476_v10 = vmul.f32 1.442695, %v474_v9 }
 0x3be   :  { %687 = vpow2.f32 %v476_v10 }
 0x3c1   :  { %v473_v42 = vpop.xlane.xlu0 %472 }
 0x3c2   :  { %v475_v11 = vsub.f32 %v467_v0, %v473_v42 }
 0x3c4   :  { %v688_v12 = vpop.eup %687  ;;  %v478_v13 = vmul.f32 1.442695, %v475_v11 }
 0x3c5   :  { %v480_v14 = vsel %vm142_vm1, %v688_v12, 0.0 }
 0x3c6   :  { %689 = vpow2.f32 %v478_v13  ;;  %481 = vadd.xlane.f32.xlu2 %v480_v14  ;;  %v741_v13 = vmov 32.0  }
 0x3c7   :  { %691 = vrcp.f32 %v274_v7 }
 0x3c9   :  { %v277_v15 = vpop.xlane.xlu0 %276 }
 0x3ca   :  { %693 = vrcp.f32 %v277_v15 }
 0x3cc   :  { %v690_v16 = vpop.eup %689 }
 0x3cd   :  { %v483_v18 = vsel %vm142_vm1, %v690_v16, 0.0  ;;  %v692_v19 = vpop.eup %691 }
 0x3ce   :  { %484 = vadd.xlane.f32.xlu0 %v483_v18  ;;  %v280_v21 = vmul.f32 %v692_v19, %v680_v44 }
 0x3d0   :  { %v694_v20 = vpop.eup %693 }
 0x3d1   :  { %v281_v22 = vmul.f32 %v694_v20, %v684_v4  ;;  %v391_v25 = vpop.xlane.xlu0 %390 }
 0x3d2   :  { %695 = vrcp.f32 %v391_v25 }
 0x3d3   :  { %v282_v23 = vpack.c.bf16 %v281_v22, %v280_v21  ;;  %697 = vrcp.f32 %v388_v24 }
 0x3d5   :  { %647 = vmatmul.msk.bf16.vlgmr.msrb.gmra.mxu2 %vm142_vm1, %v282_v23 }
 0x3d8   :  { %v696_v27 = vpop.eup %695 }
 0x3d9   :  { %v698_v28 = vpop.eup %697  ;;  %v395_v30 = vmul.f32 %v696_v27, %v686_v5 }
 0x3da   :  { %v394_v32 = vmul.f32 %v698_v28, %v890_v52  ;;  %v141_v52 = vld [vmem:[%s946_s4 + $0x3c] sm:$0xf]  ;;  %s742_s4 = smov [#allocation3]  }
 0x3db   :  { %v516_v53 = vsel %vm308_vm6, %v141_v52, 0  ;;  %s602_s10 = sshll.u32 %s742_s4, 4  ;;  %s603_s10 = int_to_ptr.vmem [resolvable:$true] %s602_s10 }
 0x3de   :  { %397 = vrot.lane.b32.xlu2 %v860_v61, %s740_s25 }
 0x3e2   :  { %491 = vrot.lane.b32.xlu0 %v860_v61, %s739_s24  ;;  %v396_v61 = vpack.c.bf16 %v395_v30, %v394_v32 }
 0x439   :  { %v482_v26 = vpop.xlane.xlu2 %481 }
 0x441   :  { %v398_v35 = vpop.permute.xlu2 %397  ;;  %v485_v36 = vpop.xlane.xlu0 %484 }
 0x442   :  { %410 = vmatpush.bf16.msra.mxu2 %v398_v35  ;;  %699 = vrcp.f32 %v485_v36 }
 0x443   :  { %701 = vrcp.f32 %v482_v26 }
 0x444   :  { %703 = vrcp.f32 %v741_v13 }
 0x445   :  { %651 = vmatmul.msk.bf16.vlgmr.msra.gmra.mxu2 %vm142_vm1, %v396_v61 }
 0x446   :  { %525 = vmatpush.bf16.msrb.mxu2 %v516_v53 }
 0x448   :  { %v700_v38 = vpop.eup %699 }
 0x449   :  { %v702_v39 = vpop.eup %701  ;;  %v489_v40 = vmul.f32 %v700_v38, %v690_v16 }
 0x44a   :  { %v488_v41 = vmul.f32 %v702_v39, %v688_v12  ;;  %v704_v14 = vpop.eup %703 }
 0x44b   :  { %v546_v15 = vmul.f32 32.0, %v704_v14  ;;  %vm550_vm7 = vweird.f32 %v704_v14 }
 0x44c   :  { %v490_v45 = vpack.c.bf16 %v489_v40, %v488_v41 }
 0x44d   :  { %v547_v16 = vsub.f32 1.0, %v546_v15 }
 0x454   :  { %v492_v44 = vpop.permute.xlu0 %491 }
 0x455   :  { %504 = vmatpush.bf16.msrb.mxu1 %v492_v44 }
 0x458   :  { %v299_v46 = vpop.f32.mrf.mxu2  ;;  %654 = vmatmul.msk.bf16.vlgmr.msrb.gmra.mxu1 %vm142_vm1, %v490_v45 }
 0x460   :  { %v301_v47 = vpop.f32.mrf.mxu2 }
 0x461   :  { %v304_v49 = vpack.c.bf16 %v301_v47, %v299_v46  ;;  %v590_v46 = vperm.slane %v818_v17, 4 }
 0x463   :  { %648 = vmatmul.msk.bf16.vlgmr.msrb.gmra.mxu3 %vm148_vm4, %v304_v49 }
 0x4c8   :  { %v412_v54 = vpop.f32.mrf.mxu2 }
 0x4d0   :  { %v414_v55 = vpop.f32.mrf.mxu2 }
 0x4d1   :  { %v417_v56 = vpack.c.bf16 %v414_v55, %v412_v54 }
 0x4d3   :  { %652 = vmatmul.msk.bf16.vlgmr.msra.gmra.mxu3 %vm148_vm4, %v417_v56 }
 0x4d5   :  { %v506_v57 = vpop.f32.mrf.mxu1 }
 0x4dd   :  { %v508_v58 = vpop.f32.mrf.mxu1 }
 0x4de   :  { %v511_v59 = vpack.c.bf16 %v508_v58, %v506_v57 }
 0x4e0   :  { %655 = vmatmul.msk.bf16.vlgmr.msrb.gmra.mxu2 %vm148_vm4, %v511_v59 }
 0x4e6   :  { %v321_v60 = vpop.f32.mrf.mxu3 }
 0x4e7   :  { %v342_v0 = vadd.f32 %v885_v43, %v321_v60 }
 0x4ee   :  { %v323_v62 = vpop.f32.mrf.mxu3 }
 0x4ef   :  { %v344_v6 = vadd.f32 %v888_v48, %v323_v62  ;;  %v548_v48 = vmul.f32 %v704_v14, %v547_v16 }
 0x4f1   :  { %v549_v18 = vadd.f32 %v704_v14, %v548_v48 }
 0x556   :  { %v433_v63 = vpop.f32.mrf.mxu3 }
 0x557   :  { %v438_v1 = vadd.f32 %v433_v63, %v342_v0 }
 0x55e   :  { %v435_v5 = vpop.f32.mrf.mxu3 }
 0x55f   :  { %v439_v8 = vadd.f32 %v435_v5, %v344_v6 }
 0x563   :  { %v527_v3 = vpop.f32.mrf.mxu2 }
 0x564   :  { %v532_v4 = vadd.f32 %v527_v3, %v438_v1 }
 0x566   :  { %v535_v37 = vadd.f32 %v534_v2, %v532_v4 }
 0x568   :  { %v537_v7 = vadd.f32 %v535_v37, %v833_v33  ;;  %v551_v33 = vsel %vm550_vm7, %v704_v14, %v549_v18 }
 0x56a   :  { %v539_v9 = vsel %vm50_vm0, %v537_v7, 0.0 }
 0x56b   :  { %v529_v10 = vpop.f32.mrf.mxu2  ;;  %540 = vadd.xlane.f32.xlu1 %v539_v9 }
 0x56c   :  { %v533_v42 = vadd.f32 %v529_v10, %v439_v8 }
 0x56e   :  { %v536_v11 = vadd.f32 %v534_v2, %v533_v42 }
 0x570   :  { %v538_v43 = vadd.f32 %v536_v11, %v838_v34 }
 0x572   :  { %v542_v12 = vsel %vm50_vm0, %v538_v43, 0.0 }
 0x573   :  { %543 = vadd.xlane.f32.xlu0 %v542_v12 }
 0x5de   :  { %v541_v19 = vpop.xlane.xlu1 %540 }
 0x5df   :  { %v552_v20 = vmul.f32 %v551_v33, %v541_v19 }
 0x5e1   :  { %v554_v21 = vsub.f32 %v537_v7, %v552_v20 }
 0x5e3   :  { %v556_v22 = vmul.f32 %v554_v21, %v554_v21 }
 0x5e5   :  { %v558_v23 = vsel %vm50_vm0, %v556_v22, 0.0 }
 0x5e6   :  { %559 = vadd.xlane.f32.xlu2 %v558_v23  ;;  %v544_v34 = vpop.xlane.xlu0 %543 }
 0x5e7   :  { %v553_v24 = vmul.f32 %v551_v33, %v544_v34 }
 0x5e9   :  { %v555_v25 = vsub.f32 %v538_v43, %v553_v24 }
 0x5eb   :  { %v557_v26 = vmul.f32 %v555_v25, %v555_v25 }
 0x5ed   :  { %v561_v27 = vsel %vm50_vm0, %v557_v26, 0.0 }
 0x5ee   :  { %562 = vadd.xlane.f32.xlu1 %v561_v27 }
 0x659   :  { %v560_v28 = vpop.xlane.xlu2 %559 }
 0x65a   :  { %v564_v29 = vmul.f32 %v560_v28, %v551_v33 }
 0x65c   :  { %v566_v30 = vadd.f32 1e-05, %v564_v29 }
 0x65e   :  { %705 = vrsqrt.f32 %v566_v30  ;;  %vm574_vm9 = vweird.f32 %v566_v30 }
 0x661   :  { %v563_v31 = vpop.xlane.xlu1 %562 }
 0x662   :  { %v565_v32 = vmul.f32 %v563_v31, %v551_v33 }
 0x664   :  { %v706_v35 = vpop.eup %705  ;;  %v567_v61 = vadd.f32 1e-05, %v565_v32 }
 0x665   :  { %v569_v36 = vmul.f32 %v706_v35, %v566_v30  ;;  %vm575_vm8 = vweird.f32 %v706_v35 }
 0x666   :  { %707 = vrsqrt.f32 %v567_v61  ;;  %vm576_vm10 = vmor %vm574_vm9, %vm575_vm8  ;;  %vm584_vm12 = vweird.f32 %v567_v61 }
 0x667   :  { %v570_v38 = vmul.f32 %v706_v35, %v569_v36 }
 0x669   :  { %v571_v39 = vmul.f32 0.5, %v570_v38 }
 0x66b   :  { %v572_v40 = vsub.f32 1.5, %v571_v39 }
 0x66c   :  { %v708_v41 = vpop.eup %707 }
 0x66d   :  { %v573_v44 = vmul.f32 %v706_v35, %v572_v40  ;;  %v579_v45 = vmul.f32 %v708_v41, %v567_v61  ;;  %vm585_vm11 = vweird.f32 %v708_v41 }
 0x66e   :  { %vm586_vm13 = vmor %vm584_vm12, %vm585_vm11 }
 0x66f   :  { %v577_v47 = vsel %vm576_vm10, %v706_v35, %v573_v44  ;;  %v580_v49 = vmul.f32 %v708_v41, %v579_v45 }
 0x670   :  { %v588_v50 = vmul.f32 %v577_v47, %v554_v21 }
 0x671   :  { %v581_v52 = vmul.f32 0.5, %v580_v49 }
 0x672   :  { %v591_v53 = vmul.f32 %v590_v46, %v588_v50 }
 0x673   :  { %v582_v54 = vsub.f32 1.5, %v581_v52 }
 0x674   :  { %v594_v55 = vadd.f32 %v593_v51, %v591_v53 }
 0x675   :  { %v583_v56 = vmul.f32 %v708_v41, %v582_v54 }
 0x676   :  { %596 = vst.msk [vmem:[#allocation3] sm:$0xff] %vm50_vm0, %v594_v55 }
 0x677   :  { %v587_v57 = vsel %vm586_vm13, %v708_v41, %v583_v56 }
 0x678   :  { %v589_v58 = vmul.f32 %v587_v57, %v555_v25 }
 0x67a   :  { %v592_v59 = vmul.f32 %v590_v46, %v589_v58 }
 0x67c   :  { %v595_v17 = vadd.f32 %v593_v51, %v592_v59 }
 0x67e   :  { %597 = vst.msk [vmem:[#allocation3 + $0x8] sm:$0xff] %vm50_vm0, %v595_v17 }
 0x67f   :  { %610 = dma.vmem_to_hbm [thread:$0]  %s603_s10, 256, %s605_s13, [#allocation4], %s743_s0, %s743_s0, %s737_s1  }
 0x680   :  { %733 = dma.done.wait [#allocation4], 256  }
 0x681   :  { %734 = vsyncadd [#allocation4], 4294967040 }
 0x682   :  { %615 = vsyncpa [#allocation4], 1 }

</bundles_post_ra>
